<compile_context>
chip_gen: v6e
topology: v6e:2x2x1
jax: 0.10.0
libtpu: 0.0.40
codegen_flags: <defaults>
</compile_context>

<pallas_src>
import functools

import jax
import jax.numpy as jnp
from jax.experimental import pallas as pl
from jax.experimental.pallas import tpu as pltpu


def _gated_pool_kernel(w_ref, patches_ref, out_ref):
    """w_ref: (C, K2*C), patches_ref: (K2*C, TN), out_ref: (C, TN)."""
    c = out_ref.shape[0]
    k2 = patches_ref.shape[0] // c

    p = patches_ref[...].astype(jnp.float32)                  # (K2*C, TN), lane-dense

    # Convolution: one fused contraction over K2*C (single MXU push per step).
    acc = jnp.dot(w_ref[...].astype(jnp.float32), p,
                  preferred_element_type=jnp.float32)         # (C, TN)

    # Max / mean pooling over the k*k window slots; each slot is a (C, TN)
    # sublane slab of the already-loaded patches value (no re-layout of lanes).
    maxv = p[0:c, :]
    sumv = p[0:c, :]
    for pq in range(1, k2):                                   # small static unroll
        sl = p[pq * c:(pq + 1) * c, :]
        maxv = jnp.maximum(maxv, sl)
        sumv = sumv + sl

    alpha = jax.nn.sigmoid(acc)
    avgv = sumv * (1.0 / k2)
    out_ref[...] = (alpha * maxv + (1.0 - alpha) * avgv).astype(out_ref.dtype)


def gated_pool_c(x_nchw, mask, kernel_size, stride, tile_n=1024):
    """Forward pass of gatedPool_c using a Pallas TPU kernel.

    x_nchw : (B, C, H, W) float32
    mask   : (C, C, k, k) float32  (PyTorch OIHW conv weight)
    returns: (B, C, H_out, W_out) float32
    """
    b, c, h, w = x_nchw.shape
    k = kernel_size
    s = stride
    h_out = (h - k) // s + 1
    w_out = (w - k) // s + 1
    k2 = k * k
    n = b * h_out * w_out

    # ---- glue: lane-dense im2col -> (K2*C, N), rows ordered pq*C + c_in ----
    if s == k:
        # Non-overlapping windows: pure reshape/transpose, no data duplication.
        xr = x_nchw[:, :, :k * h_out, :k * w_out]
        xr = xr.reshape(b, c, h_out, k, w_out, k)             # (B,C,Ho,p,Wo,q)
        patches = jnp.transpose(xr, (3, 5, 1, 0, 2, 4))       # (p,q,C,B,Ho,Wo)
    else:
        # TODO(synk): for s < k the host-side im2col duplicates data ~k2/s2-fold;
        # could be moved in-kernel via pl.ANY + manual make_async_copy.
        slabs = [x_nchw[:, :, p0:p0 + s * h_out:s, q0:q0 + s * w_out:s]
                 for p0 in range(k) for q0 in range(k)]       # each (B,C,Ho,Wo)
        patches = jnp.stack(slabs, axis=0)                    # (K2,B,C,Ho,Wo)
        patches = jnp.transpose(patches, (0, 2, 1, 3, 4))     # (K2,C,B,Ho,Wo)
    patches = patches.reshape(k2 * c, n)                      # (K2*C, N)

    # weight: (C_out, K2*C_in) matching the patches row order.
    w_flat = jnp.transpose(mask, (0, 2, 3, 1)).reshape(c, k2 * c)

    # ---- tiling: N on lanes; tile size a multiple of 128 ----
    n_lane = pl.cdiv(n, 128) * 128
    tn = max(128, min((tile_n // 128) * 128, n_lane))
    n_pad = pl.cdiv(n, tn) * tn
    if n_pad != n:
        patches = jnp.pad(patches, ((0, 0), (0, n_pad - n)))

    out = pl.pallas_call(
        _gated_pool_kernel,
        out_shape=jax.ShapeDtypeStruct((c, n_pad), x_nchw.dtype),
        grid_spec=pltpu.PrefetchScalarGridSpec(
            num_scalar_prefetch=0,
            grid=(n_pad // tn,),
            in_specs=[
                # weight: constant index map -> stays resident across the grid
                pl.BlockSpec((c, k2 * c), lambda i: (0, 0)),
                # patches: the only streamed operand, fully lane-dense block
                pl.BlockSpec((k2 * c, tn), lambda i: (0, i)),
            ],
            out_specs=pl.BlockSpec((c, tn), lambda i: (0, i)),
        ),
        compiler_params=pltpu.CompilerParams(
            dimension_semantics=("parallel",)),
    )(w_flat, patches)

    out = out[:, :n].reshape(c, b, h_out, w_out)              # (C, B, Ho, Wo)
    return jnp.transpose(out, (1, 0, 2, 3))                   # (B, C, Ho, Wo)


def _reference(x_nchw, mask, k, s):
    """Pure-JAX reference mirroring the PyTorch forward."""
    conv = jax.lax.conv_general_dilated(
        x_nchw, mask, window_strides=(s, s), padding="VALID",
        dimension_numbers=("NCHW", "OIHW", "NCHW"))
    alpha = jax.nn.sigmoid(conv)
    maxp = jax.lax.reduce_window(
        x_nchw, -jnp.inf, jax.lax.max, (1, 1, k, k), (1, 1, s, s), "VALID")
    avgp = jax.lax.reduce_window(
        x_nchw, 0.0, jax.lax.add, (1, 1, k, k), (1, 1, s, s), "VALID") / (k * k)
    return alpha * maxp + (1.0 - alpha) * avgp


if __name__ == "__main__":
    # Module config: gatedPool_c(in_channel=4, kernel_size=2, stride=2)
    B, C, H, W = 2, 4, 16, 16
    K, S = 2, 2

    key = jax.random.PRNGKey(0)
    kx, km = jax.random.split(key)
    x = jax.random.normal(kx, (B, C, H, W), dtype=jnp.float32)
    # nn.Parameter(torch.randn(in_channel, out_channel, k, k)) -> (C, C, K, K)
    mask = jax.random.normal(km, (C, C, K, K), dtype=jnp.float32)

    fn = jax.jit(functools.partial(gated_pool_c, kernel_size=K, stride=S))
    out = jax.block_until_ready(fn(x, mask))

    ref = _reference(x, mask, K, S)
    assert out.shape == (B, C, H // 2, W // 2), out.shape
    assert jnp.allclose(out, ref, rtol=1e-5, atol=1e-5), \
        float(jnp.max(jnp.abs(out - ref)))

    # Secondary check: multi-step grid (N > tile) and overlapping-stride path.
    kx2, km2 = jax.random.split(jax.random.PRNGKey(1))
    x2 = jax.random.normal(kx2, (4, 4, 64, 64), dtype=jnp.float32)
    m2 = jax.random.normal(km2, (4, 4, 3, 3), dtype=jnp.float32)
    out2 = jax.block_until_ready(
        jax.jit(functools.partial(gated_pool_c, kernel_size=3, stride=2))(x2, m2))
    ref2 = _reference(x2, m2, 3, 2)
    assert jnp.allclose(out2, ref2, rtol=1e-5, atol=1e-5), \
        float(jnp.max(jnp.abs(out2 - ref2)))

    print("KERNEL_OK")
</pallas_src>

<mosaic_0001>
module attributes {stable_mosaic.version = 11 : i64} {
  func.func @_gated_pool_kernel(%arg0: i32, %arg1: memref<4x16xf32, #tpu.memory_space<vmem>>, %arg2: memref<16x128xf32, #tpu.memory_space<vmem>>, %arg3: memref<4x128xf32, #tpu.memory_space<vmem>>) attributes {dimension_semantics = [#tpu.dimension_semantics<parallel>], iteration_bounds = array<i64: 1>, scalar_prefetch = 0 : i64, scratch_operands = 0 : i64, tpu.core_type = #tpu.core_type<tc>, window_params = [{pipeline_mode = #tpu.pipeline_mode<synchronous>, transform_indices = @transform_0, window_bounds = array<i64: 4, 16>}, {transform_indices = @transform_1, window_bounds = array<i64: 16, 128>}, {transform_indices = @transform_2, window_bounds = array<i64: 4, 128>}]} {
    %c0 = arith.constant 0 : index
    %c0_0 = arith.constant 0 : index
    %0 = vector.load %arg2[%c0, %c0_0] : memref<16x128xf32, #tpu.memory_space<vmem>>, vector<16x128xf32>
    %c0_1 = arith.constant 0 : index
    %c0_2 = arith.constant 0 : index
    %1 = vector.load %arg1[%c0_1, %c0_2] : memref<4x16xf32, #tpu.memory_space<vmem>>, vector<4x16xf32>
    %cst = arith.constant dense<0.000000e+00> : vector<4x128xf32>
    %2 = tpu.matmul %1, %0, %cst {dimension_numbers = #tpu.dot_dimension_numbers<[1], [0], [0], [1], [0, 0, 1, 1], [], []>} : vector<4x16xf32>, vector<16x128xf32>, vector<4x128xf32> -> vector<4x128xf32>
    %3 = vector.extract_strided_slice %0 {offsets = [0, 0], sizes = [4, 128], strides = [1, 1]} : vector<16x128xf32> to vector<4x128xf32>
    %4 = vector.extract_strided_slice %0 {offsets = [0, 0], sizes = [4, 128], strides = [1, 1]} : vector<16x128xf32> to vector<4x128xf32>
    %5 = vector.extract_strided_slice %0 {offsets = [4, 0], sizes = [4, 128], strides = [1, 1]} : vector<16x128xf32> to vector<4x128xf32>
    %6 = arith.maximumf %3, %5 : vector<4x128xf32>
    %7 = arith.addf %4, %5 : vector<4x128xf32>
    %8 = vector.extract_strided_slice %0 {offsets = [8, 0], sizes = [4, 128], strides = [1, 1]} : vector<16x128xf32> to vector<4x128xf32>
    %9 = arith.maximumf %6, %8 : vector<4x128xf32>
    %10 = arith.addf %7, %8 : vector<4x128xf32>
    %11 = vector.extract_strided_slice %0 {offsets = [12, 0], sizes = [4, 128], strides = [1, 1]} : vector<16x128xf32> to vector<4x128xf32>
    %12 = arith.maximumf %9, %11 : vector<4x128xf32>
    %13 = arith.addf %10, %11 : vector<4x128xf32>
    %14 = arith.negf %2 : vector<4x128xf32>
    %15 = math.exp %14 : vector<4x128xf32>
    %cst_3 = arith.constant 1.000000e+00 : f32
    %16 = vector.broadcast %cst_3 : f32 to vector<4x128xf32>
    %17 = arith.addf %16, %15 : vector<4x128xf32>
    %18 = arith.divf %16, %17 : vector<4x128xf32>
    %cst_4 = arith.constant 2.500000e-01 : f32
    %19 = vector.broadcast %cst_4 : f32 to vector<4x128xf32>
    %20 = arith.mulf %13, %19 : vector<4x128xf32>
    %21 = arith.mulf %18, %12 : vector<4x128xf32>
    %cst_5 = arith.constant 1.000000e+00 : f32
    %22 = vector.broadcast %cst_5 : f32 to vector<4x128xf32>
    %23 = arith.subf %22, %18 : vector<4x128xf32>
    %24 = arith.mulf %23, %20 : vector<4x128xf32>
    %25 = arith.addf %21, %24 : vector<4x128xf32>
    %c0_6 = arith.constant 0 : index
    %c0_7 = arith.constant 0 : index
    %26 = vector.load %arg3[%c0_6, %c0_7] : memref<4x128xf32, #tpu.memory_space<vmem>>, vector<4x128xf32>
    tpu.vector_store %arg3[%c0_6, %c0_7], %25 {strides = array<i32>} : memref<4x128xf32, #tpu.memory_space<vmem>>, vector<4x128xf32>,
    return
  }
  func.func @transform_0(%arg0: i32) -> (i32, i32) {
    %c0_i32 = arith.constant 0 : i32
    %c0_i32_0 = arith.constant 0 : i32
    %c0_i32_1 = arith.constant 0 : i32
    return %c0_i32, %c0_i32_0 : i32, i32
  }
  func.func @transform_1(%arg0: i32) -> (i32, i32) {
    %c0_i32 = arith.constant 0 : i32
    %c0_i32_0 = arith.constant 0 : i32
    return %c0_i32, %arg0 : i32, i32
  }
  func.func @transform_2(%arg0: i32) -> (i32, i32) {
    %c0_i32 = arith.constant 0 : i32
    %c0_i32_0 = arith.constant 0 : i32
    return %c0_i32, %arg0 : i32, i32
  }
}

</mosaic_0001>

<bundles_post_ra>
// kernel: gated_pool_c.1
= control target key start
LH: loop header
LB: loop body
LE: loop exit
PB: predicated region body
PF: predicated region fallthrough
CT: control target
= control target key end

     0   :  { %v134_v0 = vmov 0.0   ;;  %vm135_vm0 = vmmov 0   ;;  %vm14_vm1 = vcmask 130048   ;;  %s163_s1 = inlined_call_operand.vmem [shape: f32[16,128], index: 1, kind: input, shape index: {}]   ;;  %s164_s0 = inlined_call_operand.vmem [shape: f32[4,16], index: 0, kind: input, shape index: {}]   ;;  %s165_s2 = inlined_call_operand.vmem [shape: f32[4,128], index: 2, kind: output, shape index: {}]  }
   0x1   :  { %121 = vmatprep.subr.mxu0 %v134_v0  ;;  %v12_v1 = vld [vmem:[%s163_s1 + $0x8] sm:$0xff]  ;;  %v11_v2 = vld [vmem:[%s163_s1] sm:$0xff]  ;;  %125 = vmatprep.mubr.msk.f32.mxu0 %vm135_vm0, %v134_v0 }
   0x2   :  { %122 = vmatpush3.msra.mxu0 %v12_v1  ;;  %v89_v3 = vrot.slane %v11_v2, 4  ;;  %v13_v4 = vld [vmem:[%s164_s0] sm:$0xf]  ;;  %v96_v5 = vrot.slane %v12_v1, 4 }
   0x3   :  { %123 = vmatprep.subr.mxu0 %v134_v0 }
   0x4   :  { %124 = vmatpush3.msra.mxu0 %v11_v2  ;;  %v91_v6 = vmax.f32 %v11_v2, %v89_v3  ;;  %v92_v7 = vadd.f32 %v89_v3, %v11_v2 }
   0x5   :  { %126 = vmatmul.mubr.msk.f32.vlgmr.msra.gmra.mxu0 %vm14_vm1, %v13_v4 }
   0x6   :  { %v93_v8 = vmax.f32 %v91_v6, %v12_v1  ;;  %v94_v9 = vadd.f32 %v92_v7, %v12_v1 }
   0x8   :  { %v98_v10 = vmax.f32 %v93_v8, %v96_v5  ;;  %v99_v11 = vadd.f32 %v96_v5, %v94_v9 }
   0xa   :  { %v106_v17 = vmul.f32 0.25, %v99_v11 }
  0xc5   :  { %v84_v12 = vpop.f32.mrf.mxu0 }
  0xc6   :  { %v117_v13 = vmul.f32 -1.442695, %v84_v12 }
  0xc7   :  { %v127_v14 = vpop.f32.mrf.mxu0 }
  0xc8   :  { %130 = vpow2.f32 %v117_v13 }
  0xd5   :  { %v131_v15 = vpop.eup %130 }
  0xd6   :  { %v103_v16 = vadd.f32 1.0, %v131_v15 }
  0xd8   :  { %132 = vrcp.f32 %v103_v16 }
  0xe5   :  { %v133_v18 = vpop.eup %132 }
  0xe6   :  { %v108_v19 = vsub.f32 1.0, %v133_v18  ;;  %v107_v20 = vmul.f32 %v133_v18, %v98_v10 }
  0xe8   :  { %v109_v21 = vmul.f32 %v108_v19, %v106_v17 }
  0xea   :  { %v110_v22 = vadd.f32 %v109_v21, %v107_v20 }
  0xec   :  { %111 = vst [vmem:[%s165_s2] sm:$0xf] %v110_v22 }

</bundles_post_ra>
